<compile_context>
chip_gen: v5e
topology: v5e:2x2
jax: 0.10.0
libtpu: 0.0.40
codegen_flags: <defaults>
</compile_context>

<pallas_src>
import functools

import jax
import jax.numpy as jnp
from jax.experimental import pallas as pl
from jax.experimental.pallas import tpu as pltpu

_L_TILE = 512   # lanes per grid step (v5e-friendly; multiple of 128)
_HALO = 128     # one 128-lane halo chunk covers any kernel_size <= 129


def _num_taps(w_ref, c_in):
    return w_ref.shape[1] // c_in if w_ref.ndim == 2 else w_ref.shape[0]


def _conv_dot(w_ref, window, K, rhs_ref):
    """Conv as MXU matmul(s). window(k) -> (C_in, L) input slice for tap k."""
    if w_ref.ndim == 2:
        # Folded weights (C_out, K*C_in): build the im2col RHS in VMEM
        # scratch (sublane-aligned stores), then a single deep-contraction dot.
        C_in = rhs_ref.shape[0] // K
        for k in range(K):                                 # K small & static
            rhs_ref[k * C_in:(k + 1) * C_in, :] = window(k)
        return jnp.dot(w_ref[...], rhs_ref[...],
                       preferred_element_type=jnp.float32)
    # Per-tap weights (K, C_out, C_in): K accumulated dots (large-C_in case);
    # slices are read straight from the ref, no full-slab materialization.
    acc = jnp.dot(w_ref[0], window(0), preferred_element_type=jnp.float32)
    for k in range(1, K):
        acc = acc + jnp.dot(w_ref[k], window(k),
                            preferred_element_type=jnp.float32)
    return acc


def _conv1d_relu_single_kernel(x_ref, w_ref, b_ref, o_ref, *scratch):
    # x_ref: (1, C_in, L_out + K - 1)   o_ref: (1, C_out, L_out)
    L_out = o_ref.shape[-1]
    C_in = x_ref.shape[1]
    K = _num_taps(w_ref, C_in)
    window = lambda k: x_ref[0, :, k:k + L_out]
    acc = _conv_dot(w_ref, window, K, scratch[0] if scratch else None)
    acc = acc + b_ref[...]
    o_ref[0] = jnp.maximum(acc, 0.0).astype(o_ref.dtype)


def _conv1d_relu_tiled_kernel(x_ref, halo_ref, w_ref, b_ref, o_ref, xw_ref,
                              *scratch):
    # x_ref: (1, C_in, L_TILE) main tile; halo_ref: (1, C_in, 128) next chunk.
    # xw_ref: (C_in, L_TILE + 128) VMEM scratch = contiguous input window.
    L_tile = o_ref.shape[-1]
    C_in = x_ref.shape[1]
    K = _num_taps(w_ref, C_in)
    xw_ref[:, :L_tile] = x_ref[0]        # lane-aligned scratch stores
    xw_ref[:, L_tile:] = halo_ref[0]
    window = lambda k: xw_ref[:, k:k + L_tile]
    acc = _conv_dot(w_ref, window, K, scratch[0] if scratch else None)
    acc = acc + b_ref[...]
    o_ref[0] = jnp.maximum(acc, 0.0).astype(o_ref.dtype)


@functools.partial(jax.jit, static_argnames=("stride", "padding"))
def conv1d_relu(x, w, b, *, stride=1, padding=0):
    """Mirrors Conv1dReLU(in_c, out_c, K, stride, padding).forward(x)."""
    if stride != 1:
        raise NotImplementedError("conv1d_relu kernel supports stride=1 only")

    B, C_in, L = x.shape
    C_out, C_in_w, K = w.shape
    assert C_in_w == C_in
    assert K - 1 <= _HALO, "kernel_size too large for the 128-lane halo"
    L_out = L + 2 * padding - K + 1
    assert L_out >= 1, "non-positive conv output length"

    # Fold the K taps into one (C_out, K*C_in) weight matrix when the
    # contraction is shallow and channels are sublane-aligned; otherwise use
    # K accumulated per-tap dots.
    use_im2col = (C_in % 8 == 0) and (K * C_in <= 1024)
    if use_im2col:
        w_k = jnp.transpose(w, (0, 2, 1)).reshape(C_out, K * C_in)
    else:
        w_k = jnp.transpose(w, (2, 0, 1))                 # (K, C_out, C_in)
    b2 = b.reshape(C_out, 1)
    vmem_limit = 48 * 1024 * 1024

    if L_out <= _L_TILE:
        # ---- single lane-tile: exact shapes, full-dim blocks, no slicing ----
        x_in = jnp.pad(x, ((0, 0), (0, 0), (padding, padding))) if padding else x
        L_in = L + 2 * padding                            # == L_out + K - 1
        scratch = ([pltpu.VMEM((K * C_in, L_out), x.dtype)]
                   if use_im2col else [])
        return pl.pallas_call(
            _conv1d_relu_single_kernel,
            out_shape=jax.ShapeDtypeStruct((B, C_out, L_out), x.dtype),
            grid=(B,),
            in_specs=[
                pl.BlockSpec((1, C_in, L_in), lambda bi: (bi, 0, 0)),
                pl.BlockSpec(w_k.shape, lambda bi: (0,) * w_k.ndim),
                pl.BlockSpec((C_out, 1), lambda bi: (0, 0)),
            ],
            out_specs=pl.BlockSpec((1, C_out, L_out), lambda bi: (bi, 0, 0)),
            scratch_shapes=scratch,
            compiler_params=pltpu.CompilerParams(
                dimension_semantics=("parallel",),
                vmem_limit_bytes=vmem_limit),
        )(x_in, w_k, b2)

    # ---- tiled lane axis: grid = (batch, L-tiles), 128-lane halo input ----
    nt = pl.cdiv(L_out, _L_TILE)
    L_in = nt * _L_TILE + _HALO           # keeps every input block in-bounds
    x_in = jnp.pad(x, ((0, 0), (0, 0), (padding, L_in - L - padding)))
    hpt = _L_TILE // _HALO                # halo blocks per L-tile
    scratch = [pltpu.VMEM((C_in, _L_TILE + _HALO), x.dtype)]
    if use_im2col:
        scratch.append(pltpu.VMEM((K * C_in, _L_TILE), x.dtype))
    return pl.pallas_call(
        _conv1d_relu_tiled_kernel,
        out_shape=jax.ShapeDtypeStruct((B, C_out, L_out), x.dtype),
        grid=(B, nt),
        in_specs=[
            pl.BlockSpec((1, C_in, _L_TILE), lambda bi, li: (bi, 0, li)),
            pl.BlockSpec((1, C_in, _HALO),
                         lambda bi, li: (bi, 0, (li + 1) * hpt)),
            pl.BlockSpec(w_k.shape, lambda bi, li: (0,) * w_k.ndim),
            pl.BlockSpec((C_out, 1), lambda bi, li: (0, 0)),
        ],
        # Exact-length output: the partial last lane-tile store is
        # boundary-masked by Pallas, so no post-kernel slice is needed.
        out_specs=pl.BlockSpec((1, C_out, _L_TILE), lambda bi, li: (bi, 0, li)),
        scratch_shapes=scratch,
        compiler_params=pltpu.CompilerParams(
            dimension_semantics=("parallel", "parallel"),
            vmem_limit_bytes=vmem_limit),
    )(x_in, x_in, w_k, b2)


def _reference(x, w, b, stride, padding):
    y = jax.lax.conv_general_dilated(
        x, w,
        window_strides=(stride,),
        padding=[(padding, padding)],
        dimension_numbers=("NCH", "OIH", "NCH"),
        precision=jax.lax.Precision.HIGHEST)
    return jnp.maximum(y + b[None, :, None], 0.0)


if __name__ == "__main__":
    key = jax.random.PRNGKey(0)

    def run_case(key, B, C_in, C_out, L, K, p):
        k1, k2, k3, key = jax.random.split(key, 4)
        x = jax.random.normal(k1, (B, C_in, L), jnp.float32)
        w = 0.2 * jax.random.normal(k2, (C_out, C_in, K), jnp.float32)
        b = 0.2 * jax.random.normal(k3, (C_out,), jnp.float32)

        out = jax.block_until_ready(conv1d_relu(x, w, b, stride=1, padding=p))
        ref = _reference(x, w, b, 1, p)
        assert out.shape == ref.shape, (out.shape, ref.shape)
        assert out.dtype == ref.dtype
        assert jnp.allclose(out, ref, atol=1e-3, rtol=1e-3), (
            f"mismatch vs reference (C_in={C_in}, K={K}, L={L}, p={p})")
        return key

    # The three configurations named in the module docstring
    # (single lane-tile, per-tap MXU path).
    for kernel_size, padding in [(3, 1), (5, 2), (7, 3)]:
        key = run_case(key, 2, 4, 8, 16, kernel_size, padding)

    # A longer sequence with sublane-aligned channels: exercises the tiled
    # lane grid (two 512-lane tiles + 128-lane halo, masked partial last
    # tile) and the folded-weight (im2col) MXU path.
    key = run_case(key, 2, 16, 32, 700, 5, 2)

    print("KERNEL_OK")
</pallas_src>

<mosaic_0001>
module attributes {stable_mosaic.version = 11 : i64} {
  func.func @_conv1d_relu_single_kernel(%arg0: i32, %arg1: memref<1x4x18xf32, #tpu.memory_space<vmem>>, %arg2: memref<3x8x4xf32, #tpu.memory_space<vmem>>, %arg3: memref<8x1xf32, #tpu.memory_space<vmem>>, %arg4: memref<1x8x16xf32, #tpu.memory_space<vmem>>) attributes {dimension_semantics = [#tpu.dimension_semantics<parallel>], iteration_bounds = array<i64: 2>, scalar_prefetch = 0 : i64, scratch_operands = 0 : i64, tpu.core_type = #tpu.core_type<tc>, window_params = [{transform_indices = @transform_0, window_bounds = array<i64: 1, 4, 18>}, {pipeline_mode = #tpu.pipeline_mode<synchronous>, transform_indices = @transform_1, window_bounds = array<i64: 3, 8, 4>}, {pipeline_mode = #tpu.pipeline_mode<synchronous>, transform_indices = @transform_2, window_bounds = array<i64: 8, 1>}, {transform_indices = @transform_3, window_bounds = array<i64: 1, 8, 16>}]} {
    %c0 = arith.constant 0 : index
    %c0_0 = arith.constant 0 : index
    %c0_1 = arith.constant 0 : index
    %0 = vector.load %arg2[%c0, %c0_0, %c0_1] : memref<3x8x4xf32, #tpu.memory_space<vmem>>, vector<1x8x4xf32>
    %1 = vector.shape_cast %0 : vector<1x8x4xf32> to vector<8x4xf32>
    %c0_2 = arith.constant 0 : index
    %c0_3 = arith.constant 0 : index
    %c0_4 = arith.constant 0 : index
    %2 = vector.load %arg1[%c0_2, %c0_3, %c0_4] : memref<1x4x18xf32, #tpu.memory_space<vmem>>, vector<1x4x16xf32>
    %3 = vector.shape_cast %2 : vector<1x4x16xf32> to vector<4x16xf32>
    %cst = arith.constant dense<0.000000e+00> : vector<8x16xf32>
    %4 = tpu.matmul %1, %3, %cst {dimension_numbers = #tpu.dot_dimension_numbers<[1], [0], [0], [1], [0, 0, 1, 1], [], []>} : vector<8x4xf32>, vector<4x16xf32>, vector<8x16xf32> -> vector<8x16xf32>
    %c1 = arith.constant 1 : index
    %c0_5 = arith.constant 0 : index
    %c0_6 = arith.constant 0 : index
    %5 = vector.load %arg2[%c1, %c0_5, %c0_6] : memref<3x8x4xf32, #tpu.memory_space<vmem>>, vector<1x8x4xf32>
    %6 = vector.shape_cast %5 : vector<1x8x4xf32> to vector<8x4xf32>
    %c0_7 = arith.constant 0 : index
    %c0_8 = arith.constant 0 : index
    %c1_9 = arith.constant 1 : index
    %7 = vector.load %arg1[%c0_7, %c0_8, %c1_9] : memref<1x4x18xf32, #tpu.memory_space<vmem>>, vector<1x4x16xf32>
    %8 = vector.shape_cast %7 : vector<1x4x16xf32> to vector<4x16xf32>
    %cst_10 = arith.constant dense<0.000000e+00> : vector<8x16xf32>
    %9 = tpu.matmul %6, %8, %cst_10 {dimension_numbers = #tpu.dot_dimension_numbers<[1], [0], [0], [1], [0, 0, 1, 1], [], []>} : vector<8x4xf32>, vector<4x16xf32>, vector<8x16xf32> -> vector<8x16xf32>
    %10 = arith.addf %4, %9 : vector<8x16xf32>
    %c2 = arith.constant 2 : index
    %c0_11 = arith.constant 0 : index
    %c0_12 = arith.constant 0 : index
    %11 = vector.load %arg2[%c2, %c0_11, %c0_12] : memref<3x8x4xf32, #tpu.memory_space<vmem>>, vector<1x8x4xf32>
    %12 = vector.shape_cast %11 : vector<1x8x4xf32> to vector<8x4xf32>
    %c0_13 = arith.constant 0 : index
    %c0_14 = arith.constant 0 : index
    %c2_15 = arith.constant 2 : index
    %13 = vector.load %arg1[%c0_13, %c0_14, %c2_15] : memref<1x4x18xf32, #tpu.memory_space<vmem>>, vector<1x4x16xf32>
    %14 = vector.shape_cast %13 : vector<1x4x16xf32> to vector<4x16xf32>
    %cst_16 = arith.constant dense<0.000000e+00> : vector<8x16xf32>
    %15 = tpu.matmul %12, %14, %cst_16 {dimension_numbers = #tpu.dot_dimension_numbers<[1], [0], [0], [1], [0, 0, 1, 1], [], []>} : vector<8x4xf32>, vector<4x16xf32>, vector<8x16xf32> -> vector<8x16xf32>
    %16 = arith.addf %10, %15 : vector<8x16xf32>
    %c0_17 = arith.constant 0 : index
    %c0_18 = arith.constant 0 : index
    %17 = vector.load %arg3[%c0_17, %c0_18] : memref<8x1xf32, #tpu.memory_space<vmem>>, vector<8x1xf32>
    %18 = vector.broadcast %17 : vector<8x1xf32> to vector<8x16xf32>
    %19 = arith.addf %16, %18 : vector<8x16xf32>
    %cst_19 = arith.constant 0.000000e+00 : f32
    %20 = vector.broadcast %cst_19 : f32 to vector<8x16xf32>
    %21 = arith.maximumf %19, %20 : vector<8x16xf32>
    %c0_20 = arith.constant 0 : index
    %c0_21 = arith.constant 0 : index
    %c0_22 = arith.constant 0 : index
    %22 = vector.load %arg4[%c0_20, %c0_21, %c0_22] : memref<1x8x16xf32, #tpu.memory_space<vmem>>, vector<1x8x16xf32>
    %23 = vector.shape_cast %22 : vector<1x8x16xf32> to vector<8x16xf32>
    %24 = vector.shape_cast %21 : vector<8x16xf32> to vector<1x8x16xf32>
    tpu.vector_store %arg4[%c0_20, %c0_21, %c0_22], %24 {strides = array<i32>} : memref<1x8x16xf32, #tpu.memory_space<vmem>>, vector<1x8x16xf32>,
    return
  }
  func.func @transform_0(%arg0: i32) -> (i32, i32, i32) {
    %c0_i32 = arith.constant 0 : i32
    %c0_i32_0 = arith.constant 0 : i32
    %c0_i32_1 = arith.constant 0 : i32
    return %arg0, %c0_i32, %c0_i32_0 : i32, i32, i32
  }
  func.func @transform_1(%arg0: i32) -> (i32, i32, i32) {
    %c0_i32 = arith.constant 0 : i32
    %c0_i32_0 = arith.constant 0 : i32
    %c0_i32_1 = arith.constant 0 : i32
    %c0_i32_2 = arith.constant 0 : i32
    return %c0_i32, %c0_i32_0, %c0_i32_1 : i32, i32, i32
  }
  func.func @transform_2(%arg0: i32) -> (i32, i32) {
    %c0_i32 = arith.constant 0 : i32
    %c0_i32_0 = arith.constant 0 : i32
    %c0_i32_1 = arith.constant 0 : i32
    return %c0_i32, %c0_i32_0 : i32, i32
  }
  func.func @transform_3(%arg0: i32) -> (i32, i32, i32) {
    %c0_i32 = arith.constant 0 : i32
    %c0_i32_0 = arith.constant 0 : i32
    %c0_i32_1 = arith.constant 0 : i32
    return %arg0, %c0_i32, %c0_i32_0 : i32, i32, i32
  }
}

</mosaic_0001>

<bundles_post_ra>
// kernel: conv1d_relu.1
= control target key start
LH: loop header
LB: loop body
LE: loop exit
PB: predicated region body
PF: predicated region fallthrough
CT: control target
= control target key end

     0   :  { %8 = vsyncpa [#allocation3], 0  ;;  %s589_s0 = inlined_call_operand.vmem [shape: f32[2,4,18], index: 0, kind: input, shape index: {}]   ;;  %s590_s1 = inlined_call_operand.vmem [shape: f32[3,8,4], index: 1, kind: input, shape index: {}]   ;;  %s591_s2 = inlined_call_operand.vmem [shape: f32[8,1], index: 2, kind: input, shape index: {}]   ;;  %s592_s3 = inlined_call_operand.hbm [shape: f32[2,8,16], index: 3, kind: output, shape index: {}]  }
   0x1   :  { %10 = vsyncpa [#allocation3 + $0x1], 0  ;;  %s489_s12 = smov 0   ;;  %s491_s13 = smov 0  }
   0x2   :  { %s493_s14 = smov 0   ;;  %s495_s15 = smov 0  }
   0x3 LB: > { %s510_s16 = sadd.s32 4294967295, %s464_s15   ;;  %s340_s17 = sadd.s32 4294967294, %s464_s15   ;;  %s464_s15 = sphi %s495_s15, %s598_s15   ;;  %s460_s14 = sphi %s493_s14, %s597_s14   ;;  %s456_s13 = sphi %s491_s13, %s596_s13   ;;  %s452_s12 = sphi %s489_s12, %s595_s12  }
   0x4   : > { %s514_s18 = sadd.s32 1, %s464_s15   ;;  %s91_s19 = sadd.s32 1, %s460_s14 }
   0x5   : > { %s88_s20 = ssub.s32 %s464_s15, %s514_s18  ;;  %p101_p0 = scmp.ne.s32.totalorder %s460_s14, %s456_s13 }
   0x6   : > { %p89_p1 = scmp.eq.s32.totalorder %s88_s20, 0  ;;  %p102_p2 = scmp.eq.s32.totalorder %s510_s16, 1 }
   0x7   : > { %p107_p3 = scmp.ne.s32.totalorder %s456_s13, %s452_s12  ;;  %p108_p4 = scmp.eq.s32.totalorder %s340_s17, 1 }
   0x8   : > { %s525_s21 = scalar_select %p89_p1, %s460_s14, %s91_s19  }
   0x9   : > { %p527_p5 = por %p102_p2, %p101_p0  ;;  %p531_p6 = por %p108_p4, %p107_p3 }
   0xa   : > { %p343_p7 = scmp.ge.s32.totalorder %s464_s15, 1  ;;  %p139_p8 = scmp.lt.s32.totalorder %s464_s15, 3 }
   0xc   : > { %p140_p9 = pnand %p343_p7, %p139_p8 }
   0xd   : > { %p162_p10 = scmp.lt.s32.totalorder (!%p140_p9), %s510_s16, 1  ;;  %s466_s29 = smov (!%p140_p9), 126  }
   0xe   : > { %143 = sbr.rel (%p140_p9) target bundleno = 285 (0x11d), region = 32  ;;  %s467_s30 = smov (!%p140_p9), 127  }
   0xf   : > { %s159_s17 = sand.u32 (!%p140_p9), 1, %s456_s13   ;;  %s355_s20 = sshll.u32 (!%p140_p9), %s510_s16, 3 }
  0x10   : > { %s344_s19 = sshll.u32 (!%p140_p9), %s159_s17, 3  ;;  %s276_s26 = scalar_lea.hbm (!%p140_p9), %s592_s3, %s355_s20 }
  0x11   : > { %s161_s27 = scalar_lea.vmem (!%p140_p9), [#allocation2], %s344_s19  ;;  %s422_s7 = scalar_lea.hbm (!%p140_p9), %s592_s3, 16 }
  0x13   : > { %s163_s24 = scalar_select %p162_p10, %s510_s16, 1  ;;  %vm177_vm0 = vcmask 1043456   ;;  %vm173_vm1 = vcmask 31744   ;;  %v166_v1 = vld [vmem:[%s590_s1] sm:$0xff]  ;;  %v468_v3 = vmov 0   ;;  %v351_v4 = vld [vmem:[%s590_s1 + $0x10] sm:$0xff] }
  0x14   : > { %v255_v2 = vld [vmem:[%s591_s2] sm:$0xff]  ;;  %400 = vset.pattern.permute.xlu1 %v468_v3  ;;  %401 = vset.pattern.permute.xlu0 %v468_v3  ;;  %v346_v6 = vld [vmem:[%s590_s1 + $0x8] sm:$0xff]  ;;  %vm263_vm2 = vcmask 130048   ;;  %s266_s16 = scalar_lea.sflag [#allocation3], %s159_s17 }
  0x15   : > { %s345_s25 = sshll.u32 %s163_s24, 2  ;;  %258 = vperm.xlu1 %400, %v255_v2  }
  0x16   : > { %s165_s28 = scalar_lea.vmem %s589_s0, %s345_s25 }
  0x17   : > { %v167_v0 = vld [vmem:[%s165_s28] sm:$0xf]  ;;  %s278_s28 = sshll.u32 %s161_s27, 4  ;;  %s279_s28 = int_to_ptr.vmem [resolvable:$true] %s278_s28 }
  0x18   : > { %227 = vrot.lane.b32.xlu0 %v167_v0, %s466_s29  ;;  %349 = vmatpush.msk.msra.mxu1 %vm177_vm0, %v167_v0  ;;  %s280_s29 = sshll.u32 %s276_s26, 4  ;;  %s281_s29 = int_to_ptr.hbm [resolvable:$true] %s280_s29 }
  0x19   : > { %350 = vmatmul.msk.f32.vlgmr.msra.gmra.mxu1 %vm173_vm1, %v166_v1 }
  0x20   : > { %171 = vrot.lane.b32.xlu0 %v167_v0, %s467_s30  ;;  %s416_s30 = sshra.s32 %s281_s29, 4  ;;  %s417_s30 = int_to_ptr.hbm [resolvable:$true] %s416_s30 }
  0x21   : > { %s418_s4 = scalar_lea.hbm %s417_s30, 8  ;;  %p423_p0 = scmp.lt.s32.totalorder %s417_s30, %s592_s3 }
  0x22   : > { %p419_p11 = scmp.ne.s32.totalorder %s417_s30, %s418_s4  ;;  %p424_p1 = scmp.lt.s32.totalorder %s422_s7, %s418_s4 }
  0x24   : > { %p420_p12 = pnand %p419_p11, %p527_p5  ;;  %p425_p2 = por %p424_p1, %p423_p0 }
  0x26   : > { %p421_p13 = pneg %p420_p12 }
  0x28   : > { %p426_p3 = pnand %p425_p2, %p421_p13 }
  0x87   : > { %v259_v12 = vpop.permute.xlu1 %258 }
  0x8a   : > { %v228_v5 = vpop.permute.xlu0 %227 }
  0x8b   : > { %352 = vmatpush.msk.msra.mxu2 %vm177_vm0, %v228_v5 }
  0x8c   : > { %353 = vmatmul.msk.f32.vlgmr.msra.gmra.mxu2 %vm173_vm1, %v351_v4 }
  0x92   : > { %v172_v7 = vpop.permute.xlu0 %171 }
  0x93   : > { %347 = vmatpush.msk.msra.mxu0 %vm177_vm0, %v172_v7 }
  0x94   : > { %348 = vmatmul.msk.f32.vlgmr.msra.gmra.mxu0 %vm173_vm1, %v346_v6 }
  0x96   : > { %v222_v8 = vpop.f32.mrf.mxu1 }
 0x10f   : > { %v251_v10 = vpop.f32.mrf.mxu2 }
 0x111   : > { %v197_v9 = vpop.f32.mrf.mxu0 }
 0x112   : > { %v223_v11 = vadd.f32 %v222_v8, %v197_v9 }
 0x114   : > { %v254_v13 = vadd.f32 %v251_v10, %v223_v11 }
 0x116   : > { %v261_v14 = vadd.f32 %v259_v12, %v254_v13 }
 0x118   : > { %v262_v15 = vmax.f32 %v261_v14, 0.0 }
 0x11a   : > { %264 = vst.msk [vmem:[%s161_s27] sm:$0xff] %vm263_vm2, %v262_v15 }
 0x11b   : > { %429 = shalt.err (!%p426_p3)
}
 0x11c   : > { %358 = dma.vmem_to_hbm [thread:$0]  (%p527_p5), %s279_s28, 128, %s281_s29, %s266_s16  }
 0x11d PF: > { %p364_p4 = scmp.ge.s32.totalorder %s464_s15, 2  ;;  %s292_s10 = sand.u32 1, %s452_s12  }
 0x11e   : > { %s293_s11 = scalar_lea.sflag [#allocation3], %s292_s10 }
 0x11f   : > { %p361_p7 = pnand %p364_p4, %p531_p6 }
 0x121   : > { %p362_p8 = pneg %p361_p7 }
 0x123   : > { %447 = dma.done.wait (%p362_p8), %s293_s11, 128  }
 0x124   : > { %449 = vsyncadd (%p362_p8), %s293_s11, 4294967168  ;;  %p13_p9 = scmp.ge.s32.totalorder %s514_s18, 4   ;;  %s595_s12 = smov %s456_s13 }
 0x125   : > { %s596_s13 = smov %s460_s14  ;;  %s597_s14 = smov %s525_s21 }
 0x126   : > { %s598_s15 = smov %s514_s18  ;;  %15 = sbr.rel (!%p13_p9) target bundleno = 3 (0x3), region = 69 }
 0x12b   :  { %299 = vsyncpa [#allocation3], 1 }
 0x12c   :  { %301 = vsyncpa [#allocation3 + $0x1], 1 }

</bundles_post_ra>
